<compile_context>
chip_gen: v6e
topology: v6e:2x2x1
jax: 0.10.0
libtpu: 0.0.40
codegen_flags: <defaults>
</compile_context>

<pallas_src>
import math

import jax
import jax.numpy as jnp
from jax.experimental import pallas as pl
from jax.experimental.pallas import tpu as pltpu

LEAKY_SLOPE = 0.1
BN_EPS = 1e-5
LANE = 128
SUBLANE = 8


def _round_up(n, m):
    return ((n + m - 1) // m) * m


def _make_mlp_kernel(num_hidden):
    """Kernel over one batch tile.

    Ref order: x_ref, (w_i, b_i) for each layer (hidden blocks + classifier),
    o_ref.  Weights arrive pre-transposed (d_in, d_out), lane-padded, possibly
    bf16.  Biases are f32.  Each hidden layer is `h = leaky_relu(h @ W + b)`;
    the last layer (classifier) has no activation.
    """
    n_layers = num_hidden + 1

    def kernel(x_ref, *refs):
        o_ref = refs[-1]
        h = x_ref[...]
        for i in range(n_layers):
            w_ref = refs[2 * i]
            b = refs[2 * i + 1][...]                       # f32 (1, d_out_pad)
            h = jnp.dot(h.astype(w_ref.dtype), w_ref[...],
                        preferred_element_type=jnp.float32) + b
            if i < num_hidden:
                # LeakyReLU(0.1) == max(h, 0.1*h) for slope in (0,1); f32 VPU.
                h = jnp.maximum(h, LEAKY_SLOPE * h)
        o_ref[...] = h.astype(o_ref.dtype)

    return kernel


def _fold_params(hidden_params, classifier_params):
    """Fold eval-mode BatchNorm1d of block i into the Linear of block i+1
    (and the last BN into the classifier); pre-transpose weights to
    (d_in, d_out).  Returns a list of (W_T, bias_row) in f32."""
    fused = []
    scale = None   # BN affine of the previous block (None before the first)
    shift = None
    for p in hidden_params:
        w, b = p['w'], p['b']                       # w: (d_out, d_in)
        if scale is not None:
            b = w @ shift + b
            w = w * scale[None, :]
        fused.append((jnp.asarray(w.T, jnp.float32),
                      jnp.asarray(b.reshape(1, -1), jnp.float32)))
        inv_std = 1.0 / jnp.sqrt(p['var'] + BN_EPS)
        scale = p['gamma'] * inv_std
        shift = p['beta'] - p['mean'] * scale
    wc, bc = classifier_params['w'], classifier_params['b']
    if scale is not None:                           # guard: hidden_units may be ()
        bc = wc @ shift + bc
        wc = wc * scale[None, :]
    fused.append((jnp.asarray(wc.T, jnp.float32),
                  jnp.asarray(bc.reshape(1, -1), jnp.float32)))
    return fused


def _pad_fused(fused, in_features, compute_dtype):
    """Zero-pad every feature dim to a multiple of 128 (lane-dense) and cast
    weights to compute_dtype (biases stay f32).  Padded rows/cols of W are
    zero so padded activation columns stay exactly zero through LeakyReLU."""
    padded = []
    d_in_pad = _round_up(in_features, LANE)
    for w_t, b in fused:
        d_in, d_out = w_t.shape
        d_out_pad = _round_up(d_out, LANE)
        w_p = jnp.zeros((d_in_pad, d_out_pad), jnp.float32).at[:d_in, :d_out].set(w_t)
        b_p = jnp.zeros((1, d_out_pad), jnp.float32).at[:, :d_out].set(b)
        padded.append((w_p.astype(compute_dtype), b_p))
        d_in_pad = d_out_pad
    return padded


def _run_pallas_mlp(x, hidden_params, classifier_params,
                    compute_dtype=jnp.bfloat16, max_block_b=256):
    """Runs the folded MLP; returns the full classifier output (B, out_features)."""
    B, in_features = x.shape
    num_hidden = len(hidden_params)
    out_features = classifier_params['w'].shape[0]

    fused = _pad_fused(_fold_params(hidden_params, classifier_params),
                       in_features, compute_dtype)
    in_pad = fused[0][0].shape[0]
    out_pad = fused[-1][0].shape[1]

    # Batch tile: one big tile when it fits, otherwise 256-row parallel tiles.
    b_pad = _round_up(B, SUBLANE)
    if b_pad <= max_block_b:
        block_b = b_pad
    else:
        block_b = max_block_b
        b_pad = _round_up(b_pad, block_b)

    x_p = jnp.zeros((b_pad, in_pad), jnp.float32).at[:B, :in_features].set(
        x.astype(jnp.float32)).astype(compute_dtype)

    args = [x_p]
    in_specs = [pl.BlockSpec((block_b, in_pad), lambda i: (i, 0))]
    for w, b in fused:
        args += [w, b]
        # Constant block index -> weights/biases stay resident in VMEM.
        in_specs += [pl.BlockSpec(w.shape, lambda i: (0, 0)),
                     pl.BlockSpec(b.shape, lambda i: (0, 0))]

    out = pl.pallas_call(
        _make_mlp_kernel(num_hidden),
        out_shape=jax.ShapeDtypeStruct((b_pad, out_pad), jnp.float32),
        grid=(b_pad // block_b,),
        in_specs=in_specs,
        out_specs=pl.BlockSpec((block_b, out_pad), lambda i: (i, 0)),
        compiler_params=pltpu.CompilerParams(
            dimension_semantics=("parallel",)),
    )(*args)

    return out[:B, :out_features]


def multitask_model_forward(x, hidden_params, classifier_params,
                            task='multitask', compute_dtype=jnp.bfloat16):
    """Pallas implementation of MultiTaskModel.forward (inference semantics)."""
    if task == 'multitask':
        # Only rows 0 and 1 of the classifier output are consumed and the MLP
        # is strictly row-wise in eval mode, so compute just those two rows.
        cls2 = _run_pallas_mlp(x[:2], hidden_params, classifier_params,
                               compute_dtype=compute_dtype)
        grade, hazard = cls2[0], cls2[1]
        return grade, hazard
    return _run_pallas_mlp(x, hidden_params, classifier_params,
                           compute_dtype=compute_dtype)


def reference(x, hidden_params, classifier_params):
    """Pure-JAX mirror of the PyTorch eval-mode forward (unfolded)."""
    h = x
    for p in hidden_params:
        h = h @ p['w'].T + p['b']
        h = jnp.where(h > 0, h, LEAKY_SLOPE * h)
        h = (h - p['mean']) / jnp.sqrt(p['var'] + BN_EPS) * p['gamma'] + p['beta']
        # Dropout: identity at inference.
    return h @ classifier_params['w'].T + classifier_params['b']


if __name__ == "__main__":
    task = 'multitask'
    in_features = 32
    hidden_units = (64, 128)
    batch = 16

    key = jax.random.PRNGKey(0)
    keys = iter(jax.random.split(key, 32))

    hidden_params = []
    d_in = in_features
    for d_out in hidden_units:
        bound = 1.0 / math.sqrt(d_in)
        hidden_params.append({
            'w': jax.random.uniform(next(keys), (d_out, d_in), jnp.float32, -bound, bound),
            'b': jax.random.uniform(next(keys), (d_out,), jnp.float32, -bound, bound),
            'gamma': jax.random.uniform(next(keys), (d_out,), jnp.float32, 0.5, 1.5),
            'beta': jax.random.uniform(next(keys), (d_out,), jnp.float32, -0.1, 0.1),
            'mean': jax.random.uniform(next(keys), (d_out,), jnp.float32, -0.5, 0.5),
            'var': jax.random.uniform(next(keys), (d_out,), jnp.float32, 0.5, 1.5),
        })
        d_in = d_out

    out_features = 2 if task == 'multitask' else 1
    bound = 1.0 / math.sqrt(d_in)
    classifier_params = {
        'w': jax.random.uniform(next(keys), (out_features, d_in), jnp.float32, -bound, bound),
        'b': jax.random.uniform(next(keys), (out_features,), jnp.float32, -bound, bound),
    }

    x = jax.random.normal(next(keys), (batch, in_features), jnp.float32)

    ref = reference(x, hidden_params, classifier_params)

    # f32 compute path: bitwise-faithful semantics, tight tolerance.
    full_f32 = _run_pallas_mlp(x, hidden_params, classifier_params,
                               compute_dtype=jnp.float32)
    full_f32 = jax.block_until_ready(full_f32)
    assert full_f32.shape == (batch, out_features)
    assert jnp.allclose(full_f32, ref, rtol=1e-3, atol=1e-3), \
        "Pallas f32 output mismatch vs JAX reference"

    # bf16 compute path (MXU-native dot inputs, f32 accumulation): loose tolerance.
    full_bf16 = jax.block_until_ready(
        _run_pallas_mlp(x, hidden_params, classifier_params,
                        compute_dtype=jnp.bfloat16))
    assert jnp.allclose(full_bf16, ref, rtol=5e-2, atol=5e-2), \
        "Pallas bf16 output mismatch vs JAX reference"

    # Module-faithful multitask return: (classifier[0], classifier[1]),
    # computed on only the two consumed rows.
    grade, hazard = multitask_model_forward(x, hidden_params, classifier_params,
                                            task=task)
    grade, hazard = jax.block_until_ready((grade, hazard))
    assert grade.shape == (out_features,) and hazard.shape == (out_features,)
    assert jnp.allclose(grade, ref[0], rtol=5e-2, atol=5e-2)
    assert jnp.allclose(hazard, ref[1], rtol=5e-2, atol=5e-2)

    print("KERNEL_OK")
</pallas_src>

<mosaic_0001>
module attributes {stable_mosaic.version = 11 : i64} {
  func.func @kernel(%arg0: i32, %arg1: memref<16x128xf32, #tpu.memory_space<vmem>>, %arg2: memref<128x128xf32, #tpu.memory_space<vmem>>, %arg3: memref<1x128xf32, #tpu.memory_space<vmem>>, %arg4: memref<128x128xf32, #tpu.memory_space<vmem>>, %arg5: memref<1x128xf32, #tpu.memory_space<vmem>>, %arg6: memref<128x128xf32, #tpu.memory_space<vmem>>, %arg7: memref<1x128xf32, #tpu.memory_space<vmem>>, %arg8: memref<16x128xf32, #tpu.memory_space<vmem>>) attributes {dimension_semantics = [#tpu.dimension_semantics<parallel>], iteration_bounds = array<i64: 1>, scalar_prefetch = 0 : i64, scratch_operands = 0 : i64, tpu.core_type = #tpu.core_type<tc>, window_params = [{transform_indices = @transform_0, window_bounds = array<i64: 16, 128>}, {pipeline_mode = #tpu.pipeline_mode<synchronous>, transform_indices = @transform_1, window_bounds = array<i64: 128, 128>}, {pipeline_mode = #tpu.pipeline_mode<synchronous>, transform_indices = @transform_2, window_bounds = array<i64: 1, 128>}, {pipeline_mode = #tpu.pipeline_mode<synchronous>, transform_indices = @transform_3, window_bounds = array<i64: 128, 128>}, {pipeline_mode = #tpu.pipeline_mode<synchronous>, transform_indices = @transform_4, window_bounds = array<i64: 1, 128>}, {pipeline_mode = #tpu.pipeline_mode<synchronous>, transform_indices = @transform_5, window_bounds = array<i64: 128, 128>}, {pipeline_mode = #tpu.pipeline_mode<synchronous>, transform_indices = @transform_6, window_bounds = array<i64: 1, 128>}, {transform_indices = @transform_7, window_bounds = array<i64: 16, 128>}]} {
    %c0 = arith.constant 0 : index
    %c0_0 = arith.constant 0 : index
    %0 = vector.load %arg1[%c0, %c0_0] : memref<16x128xf32, #tpu.memory_space<vmem>>, vector<16x128xf32>
    %c0_1 = arith.constant 0 : index
    %c0_2 = arith.constant 0 : index
    %1 = vector.load %arg3[%c0_1, %c0_2] : memref<1x128xf32, #tpu.memory_space<vmem>>, vector<1x128xf32>
    %c0_3 = arith.constant 0 : index
    %c0_4 = arith.constant 0 : index
    %2 = vector.load %arg2[%c0_3, %c0_4] : memref<128x128xf32, #tpu.memory_space<vmem>>, vector<128x128xf32>
    %cst = arith.constant dense<0.000000e+00> : vector<16x128xf32>
    %3 = tpu.matmul %0, %2, %cst {dimension_numbers = #tpu.dot_dimension_numbers<[1], [0], [0], [1], [0, 0, 1, 1], [], []>} : vector<16x128xf32>, vector<128x128xf32>, vector<16x128xf32> -> vector<16x128xf32>
    %4 = vector.broadcast %1 : vector<1x128xf32> to vector<16x128xf32>
    %5 = arith.addf %3, %4 : vector<16x128xf32>
    %cst_5 = arith.constant 1.000000e-01 : f32
    %6 = vector.broadcast %cst_5 : f32 to vector<16x128xf32>
    %7 = arith.mulf %6, %5 : vector<16x128xf32>
    %8 = arith.maximumf %5, %7 : vector<16x128xf32>
    %c0_6 = arith.constant 0 : index
    %c0_7 = arith.constant 0 : index
    %9 = vector.load %arg5[%c0_6, %c0_7] : memref<1x128xf32, #tpu.memory_space<vmem>>, vector<1x128xf32>
    %c0_8 = arith.constant 0 : index
    %c0_9 = arith.constant 0 : index
    %10 = vector.load %arg4[%c0_8, %c0_9] : memref<128x128xf32, #tpu.memory_space<vmem>>, vector<128x128xf32>
    %cst_10 = arith.constant dense<0.000000e+00> : vector<16x128xf32>
    %11 = tpu.matmul %8, %10, %cst_10 {dimension_numbers = #tpu.dot_dimension_numbers<[1], [0], [0], [1], [0, 0, 1, 1], [], []>} : vector<16x128xf32>, vector<128x128xf32>, vector<16x128xf32> -> vector<16x128xf32>
    %12 = vector.broadcast %9 : vector<1x128xf32> to vector<16x128xf32>
    %13 = arith.addf %11, %12 : vector<16x128xf32>
    %cst_11 = arith.constant 1.000000e-01 : f32
    %14 = vector.broadcast %cst_11 : f32 to vector<16x128xf32>
    %15 = arith.mulf %14, %13 : vector<16x128xf32>
    %16 = arith.maximumf %13, %15 : vector<16x128xf32>
    %c0_12 = arith.constant 0 : index
    %c0_13 = arith.constant 0 : index
    %17 = vector.load %arg7[%c0_12, %c0_13] : memref<1x128xf32, #tpu.memory_space<vmem>>, vector<1x128xf32>
    %c0_14 = arith.constant 0 : index
    %c0_15 = arith.constant 0 : index
    %18 = vector.load %arg6[%c0_14, %c0_15] : memref<128x128xf32, #tpu.memory_space<vmem>>, vector<128x128xf32>
    %cst_16 = arith.constant dense<0.000000e+00> : vector<16x128xf32>
    %19 = tpu.matmul %16, %18, %cst_16 {dimension_numbers = #tpu.dot_dimension_numbers<[1], [0], [0], [1], [0, 0, 1, 1], [], []>} : vector<16x128xf32>, vector<128x128xf32>, vector<16x128xf32> -> vector<16x128xf32>
    %20 = vector.broadcast %17 : vector<1x128xf32> to vector<16x128xf32>
    %21 = arith.addf %19, %20 : vector<16x128xf32>
    %c0_17 = arith.constant 0 : index
    %c0_18 = arith.constant 0 : index
    %22 = vector.load %arg8[%c0_17, %c0_18] : memref<16x128xf32, #tpu.memory_space<vmem>>, vector<16x128xf32>
    tpu.vector_store %arg8[%c0_17, %c0_18], %21 {strides = array<i32>} : memref<16x128xf32, #tpu.memory_space<vmem>>, vector<16x128xf32>,
    return
  }
  func.func @transform_0(%arg0: i32) -> (i32, i32) {
    %c0_i32 = arith.constant 0 : i32
    %c0_i32_0 = arith.constant 0 : i32
    return %arg0, %c0_i32 : i32, i32
  }
  func.func @transform_1(%arg0: i32) -> (i32, i32) {
    %c0_i32 = arith.constant 0 : i32
    %c0_i32_0 = arith.constant 0 : i32
    %c0_i32_1 = arith.constant 0 : i32
    return %c0_i32, %c0_i32_0 : i32, i32
  }
  func.func @transform_2(%arg0: i32) -> (i32, i32) {
    %c0_i32 = arith.constant 0 : i32
    %c0_i32_0 = arith.constant 0 : i32
    %c0_i32_1 = arith.constant 0 : i32
    return %c0_i32, %c0_i32_0 : i32, i32
  }
  func.func @transform_3(%arg0: i32) -> (i32, i32) {
    %c0_i32 = arith.constant 0 : i32
    %c0_i32_0 = arith.constant 0 : i32
    %c0_i32_1 = arith.constant 0 : i32
    return %c0_i32, %c0_i32_0 : i32, i32
  }
  func.func @transform_4(%arg0: i32) -> (i32, i32) {
    %c0_i32 = arith.constant 0 : i32
    %c0_i32_0 = arith.constant 0 : i32
    %c0_i32_1 = arith.constant 0 : i32
    return %c0_i32, %c0_i32_0 : i32, i32
  }
  func.func @transform_5(%arg0: i32) -> (i32, i32) {
    %c0_i32 = arith.constant 0 : i32
    %c0_i32_0 = arith.constant 0 : i32
    %c0_i32_1 = arith.constant 0 : i32
    return %c0_i32, %c0_i32_0 : i32, i32
  }
  func.func @transform_6(%arg0: i32) -> (i32, i32) {
    %c0_i32 = arith.constant 0 : i32
    %c0_i32_0 = arith.constant 0 : i32
    %c0_i32_1 = arith.constant 0 : i32
    return %c0_i32, %c0_i32_0 : i32, i32
  }
  func.func @transform_7(%arg0: i32) -> (i32, i32) {
    %c0_i32 = arith.constant 0 : i32
    %c0_i32_0 = arith.constant 0 : i32
    return %arg0, %c0_i32 : i32, i32
  }
}

</mosaic_0001>

<bundles_post_ra>
// kernel: tpu_custom_call.1
= control target key start
LH: loop header
LB: loop body
LE: loop exit
PB: predicated region body
PF: predicated region fallthrough
CT: control target
= control target key end

     0   :  { %12 = vsyncpa [#allocation3], 0  ;;  %s770_s0 = inlined_call_operand.hbm [shape: f32[16,128], index: 0, kind: input, shape index: {}]   ;;  %s771_s1 = inlined_call_operand.hbm [shape: f32[128,128], index: 1, kind: input, shape index: {}]   ;;  %s772_s2 = inlined_call_operand.vmem [shape: f32[1,128], index: 2, kind: input, shape index: {}]   ;;  %s773_s3 = inlined_call_operand.hbm [shape: f32[128,128], index: 3, kind: input, shape index: {}]   ;;  %s774_s4 = inlined_call_operand.vmem [shape: f32[1,128], index: 4, kind: input, shape index: {}]   ;;  %s775_s5 = inlined_call_operand.hbm [shape: f32[128,128], index: 5, kind: input, shape index: {}]   ;;  %s776_s6 = inlined_call_operand.vmem [shape: f32[1,128], index: 6, kind: input, shape index: {}]   ;;  %s777_s7 = inlined_call_operand.hbm [shape: f32[16,128], index: 7, kind: output, shape index: {}]  }
   0x1   :  { %13 = vsyncpa [#allocation6], 0 }
   0x2   :  { %14 = vsyncpa [#allocation9], 0 }
   0x3   :  { %15 = vsyncpa [#allocation4], 0  ;;  %s684_s24 = smov [#allocation5]   ;;  %s685_s26 = smov [#allocation2]  }
   0x4   :  { %s33_s25 = sshll.u32 %s684_s24, 4  ;;  %s21_s27 = sshll.u32 %s685_s26, 4  ;;  %s34_s25 = int_to_ptr.vmem [resolvable:$true] %s33_s25  ;;  %s22_s27 = int_to_ptr.vmem [resolvable:$true] %s21_s27 }
   0x5   :  { %s584_s28 = scalar_lea.vmem %s34_s25, 2048  ;;  %p589_p1 = scmp.lt.s32.totalorder %s34_s25, %s34_s25 }
   0x6   :  { %p585_p0 = scmp.ne.s32.totalorder %s34_s25, %s584_s28  ;;  %p590_p2 = scmp.lt.s32.totalorder %s584_s28, %s584_s28 }
   0x8   :  { %p591_p3 = por %p590_p2, %p589_p1 }
   0xa   :  { %p592_p4 = pnand %p591_p3, %p585_p0 }
   0xc   :  { %595 = shalt.err (!%p592_p4)
}
   0xd   :  { %s686_s29 = smov 128   ;;  %s687_s30 = smov 8  }
   0xe   :  { %39 = dma.hbm_to_vmem [thread:$0]  %s771_s1, 2048, %s34_s25, [#allocation6], %s686_s29, %s686_s29, %s687_s30  }
   0xf   :  { %s604_s10 = scalar_lea.vmem %s22_s27, 256  ;;  %p609_p6 = scmp.lt.s32.totalorder %s22_s27, %s22_s27 }
  0x10   :  { %p605_p5 = scmp.ne.s32.totalorder %s22_s27, %s604_s10  ;;  %p610_p7 = scmp.lt.s32.totalorder %s604_s10, %s604_s10 }
  0x12   :  { %p611_p8 = por %p610_p7, %p609_p6 }
  0x14   :  { %p612_p9 = pnand %p611_p8, %p605_p5 }
  0x16   :  { %615 = shalt.err (!%p612_p9)
}
  0x17   :  { %27 = dma.hbm_to_vmem [thread:$0]  %s770_s0, 256, %s22_s27, [#allocation3], %s686_s29, %s686_s29, %s687_s30  }
  0x18   :  { %s688_s13 = smov [#allocation7]   ;;  %s689_s15 = smov [#allocation8]  }
  0x19   :  { %s47_s14 = sshll.u32 %s688_s13, 4  ;;  %s61_s16 = sshll.u32 %s689_s15, 4  ;;  %s48_s14 = int_to_ptr.vmem [resolvable:$true] %s47_s14  ;;  %s62_s16 = int_to_ptr.vmem [resolvable:$true] %s61_s16 }
  0x1a   :  { %s624_s1 = scalar_lea.vmem %s48_s14, 2048  ;;  %p629_p11 = scmp.lt.s32.totalorder %s48_s14, %s48_s14 }
  0x1b   :  { %p625_p10 = scmp.ne.s32.totalorder %s48_s14, %s624_s1  ;;  %p630_p12 = scmp.lt.s32.totalorder %s624_s1, %s624_s1 }
  0x1d   :  { %p631_p13 = por %p630_p12, %p629_p11 }
  0x1f   :  { %p632_p0 = pnand %p631_p13, %p625_p10 }
  0x21   :  { %635 = shalt.err (!%p632_p0)
}
  0x22   :  { %53 = dma.hbm_to_vmem [thread:$0]  %s773_s3, 2048, %s48_s14, [#allocation6], %s686_s29, %s686_s29, %s687_s30  }
  0x23   :  { %s644_s0 = scalar_lea.vmem %s62_s16, 2048  ;;  %p649_p2 = scmp.lt.s32.totalorder %s62_s16, %s62_s16 }
  0x24   :  { %p645_p1 = scmp.ne.s32.totalorder %s62_s16, %s644_s0  ;;  %p650_p3 = scmp.lt.s32.totalorder %s644_s0, %s644_s0 }
  0x26   :  { %p651_p4 = por %p650_p3, %p649_p2 }
  0x28   :  { %p652_p5 = pnand %p651_p4, %p645_p1 }
  0x2a   :  { %655 = shalt.err (!%p652_p5)
}
  0x2b   :  { %67 = dma.hbm_to_vmem [thread:$0]  %s775_s5, 2048, %s62_s16, [#allocation9], %s686_s29, %s686_s29, %s687_s30  }
  0x2c   :  { %676 = dma.done.wait [#allocation3], 256  }
  0x2d   :  { %677 = vsyncadd [#allocation3], 4294967040 }
  0x2e   :  { %678 = dma.done.wait [#allocation6], 4096  }
  0x2f   :  { %679 = vsyncadd [#allocation6], 4294963200 }
  0x30   :  { %680 = dma.done.wait [#allocation9], 2048  }
  0x31   :  { %681 = vsyncadd [#allocation9], 4294965248  ;;  %v100_v0 = vld [vmem:[#allocation5 + $0x78] sm:$0xff]  ;;  %v99_v1 = vld [vmem:[#allocation5 + $0x70] sm:$0xff]  ;;  %s690_s24 = smov [#allocation10]  }
  0x32   :  { %464 = vmatprep.subr.mxu0 %v100_v0  ;;  %v98_v2 = vld [vmem:[#allocation5 + $0x68] sm:$0xff]  ;;  %v97_v3 = vld [vmem:[#allocation5 + $0x60] sm:$0xff]  ;;  %v82_v4 = vld [vmem:[#allocation2] sm:$0xff]  ;;  %s393_s25 = sshll.u32 %s690_s24, 4  ;;  %s394_s25 = int_to_ptr.vmem [resolvable:$true] %s393_s25 }
  0x33   :  { %465 = vmatpush3.msra.mxu0 %v100_v0  ;;  %v96_v5 = vld [vmem:[#allocation5 + $0x58] sm:$0xff]  ;;  %496 = vmatprep.mubr.f32.mxu0 %v82_v4  ;;  %v201_v7 = vld [vmem:[#allocation7 + $0x70] sm:$0xff]  ;;  %v200_v9 = vld [vmem:[#allocation7 + $0x68] sm:$0xff]  ;;  %p661_p7 = scmp.lt.s32.totalorder %s394_s25, %s394_s25 }
  0x34   :  { %466 = vmatprep.subr.mxu0 %v99_v1  ;;  %v202_v6 = vld [vmem:[#allocation7 + $0x78] sm:$0xff]  ;;  %v95_v8 = vld [vmem:[#allocation5 + $0x50] sm:$0xff]  ;;  %v94_v10 = vld [vmem:[#allocation5 + $0x48] sm:$0xff] }
  0x35   :  { %467 = vmatpush3.msra.mxu0 %v99_v1  ;;  %499 = vmatprep.subr.mxu1 %v202_v6  ;;  %v199_v11 = vld [vmem:[#allocation7 + $0x60] sm:$0xff]  ;;  %v198_v13 = vld [vmem:[#allocation7 + $0x58] sm:$0xff]  ;;  %v197_v15 = vld [vmem:[#allocation7 + $0x50] sm:$0xff] }
  0x36   :  { %468 = vmatprep.subr.mxu0 %v98_v2  ;;  %500 = vmatpush3.msra.mxu1 %v202_v6  ;;  %v93_v12 = vld [vmem:[#allocation5 + $0x40] sm:$0xff]  ;;  %v92_v14 = vld [vmem:[#allocation5 + $0x38] sm:$0xff]  ;;  %v91_v16 = vld [vmem:[#allocation5 + $0x30] sm:$0xff] }
  0x37   :  { %469 = vmatpush3.msra.mxu0 %v98_v2  ;;  %501 = vmatprep.subr.mxu1 %v201_v7  ;;  %v196_v17 = vld [vmem:[#allocation7 + $0x48] sm:$0xff]  ;;  %v195_v19 = vld [vmem:[#allocation7 + $0x40] sm:$0xff]  ;;  %v194_v21 = vld [vmem:[#allocation7 + $0x38] sm:$0xff] }
  0x38   :  { %470 = vmatprep.subr.mxu0 %v97_v3  ;;  %502 = vmatpush3.msra.mxu1 %v201_v7  ;;  %v90_v18 = vld [vmem:[#allocation5 + $0x28] sm:$0xff]  ;;  %v89_v20 = vld [vmem:[#allocation5 + $0x20] sm:$0xff]  ;;  %v88_v22 = vld [vmem:[#allocation5 + $0x18] sm:$0xff] }
  0x39   :  { %471 = vmatpush3.msra.mxu0 %v97_v3  ;;  %503 = vmatprep.subr.mxu1 %v200_v9  ;;  %v193_v23 = vld [vmem:[#allocation7 + $0x30] sm:$0xff]  ;;  %v192_v25 = vld [vmem:[#allocation7 + $0x28] sm:$0xff]  ;;  %v85_v27 = vld [vmem:[#allocation5] sm:$0xff] }
  0x3a   :  { %472 = vmatprep.subr.mxu0 %v96_v5  ;;  %504 = vmatpush3.msra.mxu1 %v200_v9  ;;  %v87_v24 = vld [vmem:[#allocation5 + $0x10] sm:$0xff]  ;;  %v86_v26 = vld [vmem:[#allocation5 + $0x8] sm:$0xff]  ;;  %v83_v28 = vld [vmem:[#allocation2 + $0x8] sm:$0xff] }
  0x3b   :  { %473 = vmatpush3.msra.mxu0 %v96_v5  ;;  %505 = vmatprep.subr.mxu1 %v199_v11  ;;  %v191_v29 = vld [vmem:[#allocation7 + $0x20] sm:$0xff]  ;;  %v190_v30 = vld [vmem:[#allocation7 + $0x18] sm:$0xff]  ;;  %v189_v31 = vld [vmem:[#allocation7 + $0x10] sm:$0xff] }
  0x3c   :  { %474 = vmatprep.subr.mxu0 %v95_v8  ;;  %506 = vmatpush3.msra.mxu1 %v199_v11  ;;  %v188_v32 = vld [vmem:[#allocation7 + $0x8] sm:$0xff]  ;;  %v187_v33 = vld [vmem:[#allocation7] sm:$0xff]  ;;  %v304_v34 = vld [vmem:[#allocation8 + $0x78] sm:$0xff] }
  0x3d   :  { %475 = vmatpush3.msra.mxu0 %v95_v8  ;;  %507 = vmatprep.subr.mxu1 %v198_v13  ;;  %v303_v35 = vld [vmem:[#allocation8 + $0x70] sm:$0xff]  ;;  %v302_v36 = vld [vmem:[#allocation8 + $0x68] sm:$0xff]  ;;  %v301_v37 = vld [vmem:[#allocation8 + $0x60] sm:$0xff] }
  0x3e   :  { %476 = vmatprep.subr.mxu0 %v94_v10  ;;  %508 = vmatpush3.msra.mxu1 %v198_v13  ;;  %v300_v38 = vld [vmem:[#allocation8 + $0x58] sm:$0xff]  ;;  %v299_v39 = vld [vmem:[#allocation8 + $0x50] sm:$0xff]  ;;  %v298_v40 = vld [vmem:[#allocation8 + $0x48] sm:$0xff] }
  0x3f   :  { %477 = vmatpush3.msra.mxu0 %v94_v10  ;;  %509 = vmatprep.subr.mxu1 %v197_v15  ;;  %v297_v41 = vld [vmem:[#allocation8 + $0x40] sm:$0xff]  ;;  %v296_v42 = vld [vmem:[#allocation8 + $0x38] sm:$0xff]  ;;  %v295_v43 = vld [vmem:[#allocation8 + $0x30] sm:$0xff] }
  0x40   :  { %478 = vmatprep.subr.mxu0 %v93_v12  ;;  %510 = vmatpush3.msra.mxu1 %v197_v15  ;;  %v294_v44 = vld [vmem:[#allocation8 + $0x28] sm:$0xff]  ;;  %v407_v45 = vld [vmem:[%s772_s2] ss:$0 sm:$0xff]  ;;  %v293_v54 = vld [vmem:[#allocation8 + $0x20] sm:$0xff] }
  0x41   :  { %479 = vmatpush3.msra.mxu0 %v93_v12  ;;  %511 = vmatprep.subr.mxu1 %v196_v17  ;;  %v292_v55 = vld [vmem:[#allocation8 + $0x18] sm:$0xff]  ;;  %v291_v56 = vld [vmem:[#allocation8 + $0x10] sm:$0xff]  ;;  %v290_v57 = vld [vmem:[#allocation8 + $0x8] sm:$0xff] }
  0x42   :  { %480 = vmatprep.subr.mxu0 %v92_v14  ;;  %512 = vmatpush3.msra.mxu1 %v196_v17  ;;  %v289_v58 = vld [vmem:[#allocation8] sm:$0xff]  ;;  %v408_v59 = vld [vmem:[%s774_s4] ss:$0 sm:$0xff]  ;;  %s656_s4 = scalar_lea.vmem %s394_s25, 256 }
  0x43   :  { %481 = vmatpush3.msra.mxu0 %v92_v14  ;;  %513 = vmatprep.subr.mxu1 %v195_v19  ;;  %v409_v4 = vld [vmem:[%s776_s6] ss:$0 sm:$0xff]  ;;  %p657_p6 = scmp.ne.s32.totalorder %s394_s25, %s656_s4  ;;  %p662_p8 = scmp.lt.s32.totalorder %s656_s4, %s656_s4 }
  0x44   :  { %482 = vmatprep.subr.mxu0 %v91_v16  ;;  %514 = vmatpush3.msra.mxu1 %v195_v19 }
  0x45   :  { %483 = vmatpush3.msra.mxu0 %v91_v16  ;;  %515 = vmatprep.subr.mxu1 %v194_v21  ;;  %p663_p9 = por %p662_p8, %p661_p7 }
  0x46   :  { %484 = vmatprep.subr.mxu0 %v90_v18  ;;  %516 = vmatpush3.msra.mxu1 %v194_v21 }
  0x47   :  { %485 = vmatpush3.msra.mxu0 %v90_v18  ;;  %517 = vmatprep.subr.mxu1 %v193_v23  ;;  %p664_p10 = pnand %p663_p9, %p657_p6 }
  0x48   :  { %486 = vmatprep.subr.mxu0 %v89_v20  ;;  %518 = vmatpush3.msra.mxu1 %v193_v23 }
  0x49   :  { %487 = vmatpush3.msra.mxu0 %v89_v20  ;;  %519 = vmatprep.subr.mxu1 %v192_v25 }
  0x4a   :  { %488 = vmatprep.subr.mxu0 %v88_v22  ;;  %520 = vmatpush3.msra.mxu1 %v192_v25 }
  0x4b   :  { %489 = vmatpush3.msra.mxu0 %v88_v22  ;;  %521 = vmatprep.subr.mxu1 %v191_v29 }
  0x4c   :  { %490 = vmatprep.subr.mxu0 %v87_v24  ;;  %522 = vmatpush3.msra.mxu1 %v191_v29 }
  0x4d   :  { %491 = vmatpush3.msra.mxu0 %v87_v24  ;;  %523 = vmatprep.subr.mxu1 %v190_v30 }
  0x4e   :  { %492 = vmatprep.subr.mxu0 %v86_v26  ;;  %524 = vmatpush3.msra.mxu1 %v190_v30 }
  0x4f   :  { %493 = vmatpush3.msra.mxu0 %v86_v26  ;;  %525 = vmatprep.subr.mxu1 %v189_v31 }
  0x50   :  { %494 = vmatprep.subr.mxu0 %v85_v27  ;;  %526 = vmatpush3.msra.mxu1 %v189_v31 }
  0x51   :  { %495 = vmatpush3.msra.mxu0 %v85_v27  ;;  %527 = vmatprep.subr.mxu1 %v188_v32 }
  0x52   :  { %497 = vmatmul.mubr.f32.vlgmr.msra.gmra.mxu0 %v83_v28  ;;  %528 = vmatpush3.msra.mxu1 %v188_v32 }
  0x53   :  { %529 = vmatprep.subr.mxu1 %v187_v33  ;;  %534 = vmatprep.subr.mxu0 %v304_v34 }
  0x54   :  { %530 = vmatpush3.msra.mxu1 %v187_v33  ;;  %535 = vmatpush3.msra.mxu0 %v304_v34 }
  0x55   :  { %536 = vmatprep.subr.mxu0 %v303_v35 }
  0x56   :  { %537 = vmatpush3.msra.mxu0 %v303_v35 }
  0x57   :  { %538 = vmatprep.subr.mxu0 %v302_v36 }
  0x58   :  { %539 = vmatpush3.msra.mxu0 %v302_v36 }
  0x59   :  { %540 = vmatprep.subr.mxu0 %v301_v37 }
  0x5a   :  { %541 = vmatpush3.msra.mxu0 %v301_v37 }
  0x5b   :  { %542 = vmatprep.subr.mxu0 %v300_v38 }
  0x5c   :  { %543 = vmatpush3.msra.mxu0 %v300_v38 }
  0x5d   :  { %544 = vmatprep.subr.mxu0 %v299_v39 }
  0x5e   :  { %545 = vmatpush3.msra.mxu0 %v299_v39 }
  0x5f   :  { %546 = vmatprep.subr.mxu0 %v298_v40 }
  0x60   :  { %547 = vmatpush3.msra.mxu0 %v298_v40 }
  0x61   :  { %548 = vmatprep.subr.mxu0 %v297_v41 }
  0x62   :  { %549 = vmatpush3.msra.mxu0 %v297_v41 }
  0x63   :  { %550 = vmatprep.subr.mxu0 %v296_v42 }
  0x64   :  { %551 = vmatpush3.msra.mxu0 %v296_v42 }
  0x65   :  { %552 = vmatprep.subr.mxu0 %v295_v43 }
  0x66   :  { %553 = vmatpush3.msra.mxu0 %v295_v43 }
  0x67   :  { %554 = vmatprep.subr.mxu0 %v294_v44 }
  0x68   :  { %555 = vmatpush3.msra.mxu0 %v294_v44 }
  0x69   :  { %556 = vmatprep.subr.mxu0 %v293_v54 }
  0x6a   :  { %557 = vmatpush3.msra.mxu0 %v293_v54 }
  0x6b   :  { %558 = vmatprep.subr.mxu0 %v292_v55 }
  0x6c   :  { %559 = vmatpush3.msra.mxu0 %v292_v55 }
  0x6d   :  { %560 = vmatprep.subr.mxu0 %v291_v56 }
  0x6e   :  { %561 = vmatpush3.msra.mxu0 %v291_v56 }
  0x6f   :  { %562 = vmatprep.subr.mxu0 %v290_v57 }
  0x70   :  { %563 = vmatpush3.msra.mxu0 %v290_v57 }
  0x71   :  { %564 = vmatprep.subr.mxu0 %v289_v58 }
  0x72   :  { %565 = vmatpush3.msra.mxu0 %v289_v58 }
 0x112   :  { %v498_v46 = vpop.f32.mrf.mxu0 }
 0x113   :  { %v179_v47 = vadd.f32 %v498_v46, %v407_v45 }
 0x114   :  { %v173_v48 = vpop.f32.mrf.mxu0 }
 0x115   :  { %v174_v49 = vadd.f32 %v407_v45, %v173_v48  ;;  %v183_v50 = vmul.f32 0.1, %v179_v47 }
 0x117   :  { %v182_v51 = vmul.f32 0.1, %v174_v49  ;;  %v185_v53 = vmax.f32 %v179_v47, %v183_v50 }
 0x119   :  { %v184_v52 = vmax.f32 %v174_v49, %v182_v51 }
 0x11b   :  { %531 = vmatprep.mubr.f32.mxu1 %v184_v52 }
 0x11c   :  { %532 = vmatmul.mubr.f32.vlgmr.msra.gmra.mxu1 %v185_v53 }
 0x1dc   :  { %v533_v60 = vpop.f32.mrf.mxu1 }
 0x1dd   :  { %v281_v61 = vadd.f32 %v533_v60, %v408_v59 }
 0x1de   :  { %v275_v62 = vpop.f32.mrf.mxu1 }
 0x1df   :  { %v276_v63 = vadd.f32 %v408_v59, %v275_v62  ;;  %v285_v0 = vmul.f32 0.1, %v281_v61 }
 0x1e1   :  { %v284_v1 = vmul.f32 0.1, %v276_v63  ;;  %v287_v3 = vmax.f32 %v281_v61, %v285_v0 }
 0x1e3   :  { %v286_v2 = vmax.f32 %v276_v63, %v284_v1 }
 0x1e5   :  { %566 = vmatprep.mubr.f32.mxu0 %v286_v2 }
 0x1e6   :  { %567 = vmatmul.mubr.f32.vlgmr.msra.gmra.mxu0 %v287_v3 }
 0x2a6   :  { %v568_v5 = vpop.f32.mrf.mxu0 }
 0x2a7   :  { %v383_v6 = vadd.f32 %v568_v5, %v409_v4 }
 0x2a8   :  { %v377_v7 = vpop.f32.mrf.mxu0 }
 0x2a9   :  { %387 = vst [vmem:[#allocation10 + $0x8] sm:$0xff] %v383_v6  ;;  %v378_v8 = vadd.f32 %v409_v4, %v377_v7 }
 0x2ab   :  { %386 = vst [vmem:[#allocation10] sm:$0xff] %v378_v8 }
 0x2ac   :  { %667 = shalt.err (!%p664_p10)
}
 0x2ad   :  { %399 = dma.vmem_to_hbm [thread:$0]  %s394_s25, 256, %s777_s7, [#allocation4], %s686_s29, %s686_s29, %s687_s30  }
 0x2ae   :  { %682 = dma.done.wait [#allocation4], 256  }
 0x2af   :  { %683 = vsyncadd [#allocation4], 4294967040 }
 0x2b0   :  { %403 = vsyncpa [#allocation3], 1 }
 0x2b1   :  { %404 = vsyncpa [#allocation6], 1 }
 0x2b2   :  { %405 = vsyncpa [#allocation9], 1 }
 0x2b3   :  { %406 = vsyncpa [#allocation4], 1 }

</bundles_post_ra>
